<compile_context>
chip_gen: v7x
topology: tpu7x:2x2x1
jax: 0.10.0
libtpu: 0.0.40
codegen_flags: <defaults>
</compile_context>

<pallas_src>
import functools
import math

import jax
import jax.numpy as jnp
from jax.experimental import pallas as pl
from jax.experimental.pallas import tpu as pltpu


def gcmc_graph_conv_kernel(x_ref, wn_ref, wr_ref, a_ref, rev_ref, sw_ref, out_ref):
    """One (Nd-tile i, E-tile j) grid step.

    x_ref   (Ns, D)    bf16  source-node features (full)
    wn_ref  (D, D)     bf16  node_w.weight^T (full)
    wr_ref  (R, D)     bf16  review_w.weight^T (full)
    a_ref   (tnd, Ns)  f32   weighted adjacency tile (edge_w folded in)
    rev_ref (te, R)    bf16  review features for this edge block
    sw_ref  (tnd, te)  f32   weighted dst-incidence tile (edge_w folded in)
    out_ref (tnd, D)   f32   output tile (resident accumulator across E axis)
    """
    j = pl.program_id(1)

    # Node path once per Nd tile (independent of the edge/reduction axis):
    #   out_node = A_tile @ (x @ Wn^T)      (bf16 MXU projection, f32 aggregation)
    @pl.when(j == 0)
    def _():
        h = jnp.dot(x_ref[...], wn_ref[...],
                    preferred_element_type=jnp.float32)            # (Ns, D) f32
        out_ref[...] = jnp.dot(a_ref[...], h,
                               preferred_element_type=jnp.float32)  # (tnd, D)

    # Review/message path for this edge block:
    #   RF = review_blk @ Wr^T (bf16 MXU, f32 acc), then weighted scatter-add
    #   S_w_tile @ RF accumulated into the resident output block.
    # TODO(synk): training-time dropout on edge weights not implemented (eval
    # semantics, dropout_rate=0.0 -> identity).
    rf = jnp.dot(rev_ref[...], wr_ref[...],
                 preferred_element_type=jnp.float32)                # (te, D) f32
    out_ref[...] += jnp.dot(sw_ref[...], rf,
                            preferred_element_type=jnp.float32)     # (tnd, D)


@functools.partial(jax.jit, static_argnums=(7,))
def gcmc_graph_conv(x_src, w_node_t, review_feat, w_review_t,
                    src_ids, dst_ids, edge_w, num_dst):
    """x_src: (Ns, D), w_node_t: (D, D), review_feat: (E, R), w_review_t: (R, D),
    src_ids/dst_ids: (E,) int32, edge_w: (E,). Returns (num_dst, D) f32."""
    Ns, D = x_src.shape
    E, R = review_feat.shape
    Nd = num_dst
    edge_w = edge_w.reshape(E).astype(jnp.float32)

    # Structure-only operators with edge weights folded in (replaces the
    # in-kernel one-hot gather/scatter and the (E, D) edge-weight multiply).
    # TODO(synk): for very large graphs replace the dense (Nd, E) incidence with
    # a scalar-prefetch (SMEM ids) gather/scatter pipeline.
    A = jnp.zeros((Nd, Ns), jnp.float32).at[dst_ids, src_ids].add(edge_w)
    S_w = jnp.zeros((Nd, E), jnp.float32).at[dst_ids, jnp.arange(E)].add(edge_w)

    # Tiling: Nd in sublane-aligned chunks (parallel -> both TCs on v7x),
    # E as the reduction axis (arbitrary) so the kernel scales past VMEM.
    tnd = 8 if Nd % 8 == 0 else Nd
    te = E if E <= 512 else 512
    assert Nd % tnd == 0 and E % te == 0, "demo wrapper requires divisible tiles"
    if te < E:
        assert te % 128 == 0  # lane constraint on the (tnd, te) incidence block
    grid = (Nd // tnd, E // te)

    # bf16 operands for the projection matmuls (f32 accumulation); weighted
    # structure operators stay f32 (keeps edge_w exact). No bf16 VPU work.
    x_b = x_src.astype(jnp.bfloat16)
    wn_b = w_node_t.astype(jnp.bfloat16)
    wr_b = w_review_t.astype(jnp.bfloat16)
    rev_b = review_feat.astype(jnp.bfloat16)

    return pl.pallas_call(
        gcmc_graph_conv_kernel,
        out_shape=jax.ShapeDtypeStruct((Nd, D), jnp.float32),
        grid=grid,
        in_specs=[
            pl.BlockSpec((Ns, D), lambda i, j: (0, 0)),     # x (full, bf16)
            pl.BlockSpec((D, D), lambda i, j: (0, 0)),      # Wn^T (full, bf16)
            pl.BlockSpec((R, D), lambda i, j: (0, 0)),      # Wr^T (full, bf16)
            pl.BlockSpec((tnd, Ns), lambda i, j: (i, 0)),   # A tile (f32)
            pl.BlockSpec((te, R), lambda i, j: (j, 0)),     # review block (bf16)
            pl.BlockSpec((tnd, te), lambda i, j: (i, j)),   # S_w tile (f32)
        ],
        out_specs=pl.BlockSpec((tnd, D), lambda i, j: (i, 0)),
        compiler_params=pltpu.CompilerParams(
            dimension_semantics=("parallel", "arbitrary")),
    )(x_b, wn_b, wr_b, A, rev_b, S_w)


def xavier_uniform(key, out_dim, in_dim):
    bound = math.sqrt(6.0 / (in_dim + out_dim))
    return jax.random.uniform(key, (out_dim, in_dim), jnp.float32, -bound, bound)


if __name__ == "__main__":
    # Module hyperparameters (consistent with __init__):
    #   num_factor = 4 -> hidden D = 64 // num_factor = 16
    #   out_feats  = 8 -> review feature dim R = out_feats * num_factor = 32
    num_factor = 4
    out_feats = 8
    D = 64 // num_factor          # 16
    R = out_feats * num_factor    # 32

    Ns, Nd, E = 32, 24, 64        # src nodes, dst nodes, edges

    key = jax.random.PRNGKey(0)
    k_xn, k_rv, k_wn, k_wr, k_src, k_dst, k_ew = jax.random.split(key, 7)

    # Inputs
    x_src = jax.random.normal(k_xn, (Ns, D), jnp.float32)       # feat[0]['h_*']
    review_feat = jax.random.normal(k_rv, (E, R), jnp.float32)  # edata['review_feat']
    src_ids = jax.random.randint(k_src, (E,), 0, Ns, jnp.int32)
    dst_ids = jax.random.randint(k_dst, (E,), 0, Nd, jnp.int32)
    edge_w = jax.random.uniform(k_ew, (E,), jnp.float32)        # edata['w']

    # Parameters (torch.nn.Linear stores weight as (out, in); we pass W^T)
    w_node = xavier_uniform(k_wn, D, D)        # node_w.weight   (D, D)
    w_review = xavier_uniform(k_wr, D, R)      # review_w.weight (D, R)
    w_node_t = w_node.T                        # (D, D)
    w_review_t = w_review.T                    # (R, D)

    out = gcmc_graph_conv(x_src, w_node_t, review_feat, w_review_t,
                          src_ids, dst_ids, edge_w, Nd)
    out = jax.block_until_ready(out)

    # Pure-f32 reference (exact module semantics).
    h_ref = x_src @ w_node_t
    rf_ref = review_feat @ w_review_t
    m_ref = (h_ref[src_ids] + rf_ref) * edge_w[:, None]
    ref_f32 = jax.ops.segment_sum(m_ref, dst_ids, num_segments=Nd)

    # bf16-operand reference (same rounding of the projection operands as the
    # kernel's MXU inputs) -> tight check of the fused gather/scatter structure.
    xb = x_src.astype(jnp.bfloat16).astype(jnp.float32)
    wnb = w_node_t.astype(jnp.bfloat16).astype(jnp.float32)
    rvb = review_feat.astype(jnp.bfloat16).astype(jnp.float32)
    wrb = w_review_t.astype(jnp.bfloat16).astype(jnp.float32)
    m_b = ((xb @ wnb)[src_ids] + rvb @ wrb) * edge_w[:, None]
    ref_b = jax.ops.segment_sum(m_b, dst_ids, num_segments=Nd)

    assert out.shape == (Nd, D)
    err_struct = float(jnp.max(jnp.abs(out - ref_b)))
    err_full = float(jnp.max(jnp.abs(out - ref_f32)))
    assert jnp.allclose(out, ref_b, atol=2e-2, rtol=2e-2), (
        f"structural mismatch, max abs err {err_struct}")
    # bf16 projection operands -> loosened tolerance vs the pure-f32 module math.
    assert jnp.allclose(out, ref_f32, atol=5e-2, rtol=5e-2), (
        f"bf16 drift too large, max abs err {err_full}")
    print("KERNEL_OK")
</pallas_src>

<mosaic_0001>
module attributes {stable_mosaic.version = 11 : i64} {
  func.func private @main(%arg0: i32) attributes {dimension_semantics = [#tpu.dimension_semantics<core_parallel>], iteration_bounds = array<i64: 2>, tpu.core_type = #tpu.core_type<sc_scalar_subcore>, window_params = []} {
    return
  }
}

module attributes {stable_mosaic.version = 11 : i64} {
  func.func private @main(%arg0: i32) attributes {dimension_semantics = [#tpu.dimension_semantics<core_parallel>], iteration_bounds = array<i64: 2>, tpu.core_type = #tpu.core_type<sc_scalar_subcore>, window_params = []} {
    return
  }
}

module attributes {stable_mosaic.version = 11 : i64} {
  func.func @gcmc_graph_conv_kernel(%arg0: i32, %arg1: i32, %arg2: memref<32x16xbf16, #tpu.memory_space<vmem>>, %arg3: memref<16x16xbf16, #tpu.memory_space<vmem>>, %arg4: memref<32x16xbf16, #tpu.memory_space<vmem>>, %arg5: memref<8x32xf32, #tpu.memory_space<vmem>>, %arg6: memref<64x32xbf16, #tpu.memory_space<vmem>>, %arg7: memref<8x64xf32, #tpu.memory_space<vmem>>, %arg8: memref<8x16xf32, #tpu.memory_space<vmem>>) attributes {dimension_semantics = [#tpu.dimension_semantics<parallel>, #tpu.dimension_semantics<arbitrary>], iteration_bounds = array<i64: 3, 1>, scalar_prefetch = 0 : i64, scratch_operands = 0 : i64, tpu.core_type = #tpu.core_type<tc>, window_params = [{pipeline_mode = #tpu.pipeline_mode<synchronous>, transform_indices = @transform_0, window_bounds = array<i64: 32, 16>}, {pipeline_mode = #tpu.pipeline_mode<synchronous>, transform_indices = @transform_1, window_bounds = array<i64: 16, 16>}, {pipeline_mode = #tpu.pipeline_mode<synchronous>, transform_indices = @transform_2, window_bounds = array<i64: 32, 16>}, {transform_indices = @transform_3, window_bounds = array<i64: 8, 32>}, {transform_indices = @transform_4, window_bounds = array<i64: 64, 32>}, {transform_indices = @transform_5, window_bounds = array<i64: 8, 64>}, {transform_indices = @transform_6, window_bounds = array<i64: 8, 16>}]} {
    %c0_i32 = arith.constant 0 : i32
    %0 = arith.cmpi eq, %arg1, %c0_i32 : i32
    %1 = arith.extui %0 : i1 to i32
    %c0_i32_0 = arith.constant 0 : i32
    %2 = arith.cmpi ne, %1, %c0_i32_0 : i32
    scf.if %2 {
      %c0_11 = arith.constant 0 : index
      %c0_12 = arith.constant 0 : index
      %11 = vector.load %arg2[%c0_11, %c0_12] : memref<32x16xbf16, #tpu.memory_space<vmem>>, vector<32x16xbf16>
      %c0_13 = arith.constant 0 : index
      %c0_14 = arith.constant 0 : index
      %12 = vector.load %arg3[%c0_13, %c0_14] : memref<16x16xbf16, #tpu.memory_space<vmem>>, vector<16x16xbf16>
      %cst_15 = arith.constant dense<0.000000e+00> : vector<32x16xf32>
      %13 = tpu.matmul %11, %12, %cst_15 {dimension_numbers = #tpu.dot_dimension_numbers<[1], [0], [0], [1], [0, 0, 1, 1], [], []>} : vector<32x16xbf16>, vector<16x16xbf16>, vector<32x16xf32> -> vector<32x16xf32>
      %c0_16 = arith.constant 0 : index
      %c0_17 = arith.constant 0 : index
      %14 = vector.load %arg5[%c0_16, %c0_17] : memref<8x32xf32, #tpu.memory_space<vmem>>, vector<8x32xf32>
      %cst_18 = arith.constant dense<0.000000e+00> : vector<8x16xf32>
      %15 = tpu.matmul %14, %13, %cst_18 {dimension_numbers = #tpu.dot_dimension_numbers<[1], [0], [0], [1], [0, 0, 1, 1], [], []>} : vector<8x32xf32>, vector<32x16xf32>, vector<8x16xf32> -> vector<8x16xf32>
      %c0_19 = arith.constant 0 : index
      %c0_20 = arith.constant 0 : index
      %16 = vector.load %arg8[%c0_19, %c0_20] : memref<8x16xf32, #tpu.memory_space<vmem>>, vector<8x16xf32>
      tpu.vector_store %arg8[%c0_19, %c0_20], %15 {strides = array<i32>} : memref<8x16xf32, #tpu.memory_space<vmem>>, vector<8x16xf32>,
    } else {
    }
    %c0 = arith.constant 0 : index
    %c0_1 = arith.constant 0 : index
    %3 = vector.load %arg6[%c0, %c0_1] : memref<64x32xbf16, #tpu.memory_space<vmem>>, vector<64x32xbf16>
    %c0_2 = arith.constant 0 : index
    %c0_3 = arith.constant 0 : index
    %4 = vector.load %arg4[%c0_2, %c0_3] : memref<32x16xbf16, #tpu.memory_space<vmem>>, vector<32x16xbf16>
    %cst = arith.constant dense<0.000000e+00> : vector<64x16xf32>
    %5 = tpu.matmul %3, %4, %cst {dimension_numbers = #tpu.dot_dimension_numbers<[1], [0], [0], [1], [0, 0, 1, 1], [], []>} : vector<64x32xbf16>, vector<32x16xbf16>, vector<64x16xf32> -> vector<64x16xf32>
    %c0_4 = arith.constant 0 : index
    %c0_5 = arith.constant 0 : index
    %6 = vector.load %arg8[%c0_4, %c0_5] : memref<8x16xf32, #tpu.memory_space<vmem>>, vector<8x16xf32>
    %c0_6 = arith.constant 0 : index
    %c0_7 = arith.constant 0 : index
    %7 = vector.load %arg7[%c0_6, %c0_7] : memref<8x64xf32, #tpu.memory_space<vmem>>, vector<8x64xf32>
    %cst_8 = arith.constant dense<0.000000e+00> : vector<8x16xf32>
    %8 = tpu.matmul %7, %5, %cst_8 {dimension_numbers = #tpu.dot_dimension_numbers<[1], [0], [0], [1], [0, 0, 1, 1], [], []>} : vector<8x64xf32>, vector<64x16xf32>, vector<8x16xf32> -> vector<8x16xf32>
    %9 = arith.addf %6, %8 : vector<8x16xf32>
    %c0_9 = arith.constant 0 : index
    %c0_10 = arith.constant 0 : index
    %10 = vector.load %arg8[%c0_9, %c0_10] : memref<8x16xf32, #tpu.memory_space<vmem>>, vector<8x16xf32>
    tpu.vector_store %arg8[%c0_9, %c0_10], %9 {strides = array<i32>} : memref<8x16xf32, #tpu.memory_space<vmem>>, vector<8x16xf32>,
    return
  }
  func.func @transform_0(%arg0: i32, %arg1: i32) -> (i32, i32) {
    %c0_i32 = arith.constant 0 : i32
    %c0_i32_0 = arith.constant 0 : i32
    %c0_i32_1 = arith.constant 0 : i32
    return %c0_i32, %c0_i32_0 : i32, i32
  }
  func.func @transform_1(%arg0: i32, %arg1: i32) -> (i32, i32) {
    %c0_i32 = arith.constant 0 : i32
    %c0_i32_0 = arith.constant 0 : i32
    %c0_i32_1 = arith.constant 0 : i32
    return %c0_i32, %c0_i32_0 : i32, i32
  }
  func.func @transform_2(%arg0: i32, %arg1: i32) -> (i32, i32) {
    %c0_i32 = arith.constant 0 : i32
    %c0_i32_0 = arith.constant 0 : i32
    %c0_i32_1 = arith.constant 0 : i32
    return %c0_i32, %c0_i32_0 : i32, i32
  }
  func.func @transform_3(%arg0: i32, %arg1: i32) -> (i32, i32) {
    %c0_i32 = arith.constant 0 : i32
    %c0_i32_0 = arith.constant 0 : i32
    return %arg0, %c0_i32 : i32, i32
  }
  func.func @transform_4(%arg0: i32, %arg1: i32) -> (i32, i32) {
    %c0_i32 = arith.constant 0 : i32
    %c0_i32_0 = arith.constant 0 : i32
    return %arg1, %c0_i32 : i32, i32
  }
  func.func @transform_5(%arg0: i32, %arg1: i32) -> (i32, i32) {
    %c0_i32 = arith.constant 0 : i32
    return %arg0, %arg1 : i32, i32
  }
  func.func @transform_6(%arg0: i32, %arg1: i32) -> (i32, i32) {
    %c0_i32 = arith.constant 0 : i32
    %c0_i32_0 = arith.constant 0 : i32
    return %arg0, %c0_i32 : i32, i32
  }
}

</mosaic_0001>

<bundles_post_ra>
// kernel: gcmc_graph_conv.1
= control target key start
LH: loop header
LB: loop body
LE: loop exit
PB: predicated region body
PF: predicated region fallthrough
CT: control target
= control target key end

     0   :  { %11 = vsyncpa [#allocation3], 0  ;;  %s1378_s0 = inlined_call_operand.vmem [shape: bf16[32,16], index: 0, kind: input, shape index: {}]   ;;  %s1379_s1 = inlined_call_operand.vmem [shape: bf16[16,16], index: 1, kind: input, shape index: {}]   ;;  %s1380_s2 = inlined_call_operand.vmem [shape: bf16[32,16], index: 2, kind: input, shape index: {}]   ;;  %s1381_s3 = inlined_call_operand.hbm [shape: f32[24,32], index: 3, kind: input, shape index: {}]   ;;  %s1382_s4 = inlined_call_operand.vmem [shape: bf16[64,32], index: 4, kind: input, shape index: {}]   ;;  %s1383_s5 = inlined_call_operand.hbm [shape: f32[24,64], index: 5, kind: input, shape index: {}]   ;;  %s1384_s6 = inlined_call_operand.vmem [shape: f32[24,16], index: 6, kind: output, shape index: {}]  }
   0x1   :  { %13 = vsyncpa [#allocation3 + $0x1], 0 }
   0x2   :  { %14 = vsyncpa [#allocation5], 0 }
   0x3   :  { %16 = vsyncpa [#allocation5 + $0x1], 0  ;;  %s1162_s21 = smov 0   ;;  %s1164_s22 = smov 0  }
   0x4   :  { %s1166_s23 = smov 0   ;;  %s1168_s24 = smov 0  }
   0x5   :  { %s1170_s25 = smov 0   ;;  %s1172_s26 = smov 0  }
   0x6 LB: > { %s813_s27 = sadd.s32 4294967295, %s1120_s26   ;;  %s34_s28 = sadd.s32 1, %s1116_s25  ;;  %s1120_s26 = sphi %s1172_s26, %s22_s26   ;;  %s1116_s25 = sphi %s1170_s25, %s1398_s25   ;;  %s1112_s24 = sphi %s1168_s24, %s1397_s24   ;;  %s1108_s23 = sphi %s1166_s23, %s1396_s23   ;;  %s1104_s22 = sphi %s1164_s22, %s1395_s22   ;;  %s1100_s21 = sphi %s1162_s21, %s1394_s21  }
   0x7   : > { %p36_p0 = scmp.ge.s32.totalorder %s34_s28, 3  ;;  %s104_s29 = sadd.s32 1, %s1108_s23 }
   0x8   : > { %p111_p1 = scmp.ne.s32.totalorder %s1108_s23, %s1104_s22  ;;  %p112_p2 = scmp.eq.s32.totalorder %s1120_s26, 0 }
   0x9   : > { %s1400_s28 = smov (%p36_p0, %s34_s28), 0  ;;  %p117_p4 = scmp.ne.s32.totalorder %s1104_s22, %s1100_s21 }
   0xa   : > { %p1198_p3 = por %p112_p2, %p111_p1  ;;  %s101_s7 = ssub.s32 %s1116_s25, %s1400_s28 }
   0xb   : > { %p118_p5 = scmp.eq.s32.totalorder %s813_s27, 0  ;;  %p102_p6 = scmp.eq.s32.totalorder %s101_s7, 0 }
   0xc   : > { %p945_p8 = scmp.lt.s32.totalorder %s1120_s26, 3  ;;  %s1214_s10 = sand.u32 1, %s1108_s23  }
   0xd   : > { %p1205_p7 = por %p118_p5, %p117_p4  ;;  %s819_s11 = sshll.u32 %s1116_s25, 7 }
   0xe   : > { %s1211_s9 = scalar_select %p102_p6, %s1108_s23, %s104_s29  }
   0xf   : > { %s1387_s8 = scalar_select %p1205_p7, 1, 0 }
  0x10   : > { %s818_s12 = sshll.u32 %s1214_s10, 3  ;;  %s1223_s15 = scalar_lea.hbm %s1381_s3, %s819_s11 }
  0x11   : > { %s243_s16 = scalar_lea.vmem [#allocation2], %s818_s12  ;;  %p1229_p9 = pnand %p945_p8, %p1198_p3 }
  0x12   : > { %s250_s17 = sshll.u32 %s243_s16, 4  ;;  %s240_s19 = scalar_lea.sflag [#allocation3], %s1214_s10  ;;  %s1233_s17 = int_to_ptr.vmem [resolvable:$true] %s250_s17 }
  0x13   : > { %s1006_s20 = scalar_lea.hbm %s1223_s15, 128  ;;  %p1008_p13 = pneg %p1229_p9 }
  0x14   : > { %p1007_p12 = scmp.ne.s32.totalorder %s1223_s15, %s1006_s20  ;;  %s1011_s29 = scalar_lea.hbm %s1381_s3, 384 }
  0x15   : > { %p1012_p2 = scmp.lt.u32.totalorder %s1223_s15, %s1381_s3  ;;  %p1013_p3 = scmp.lt.u32.totalorder %s1011_s29, %s1006_s20 }
  0x16   : > { %p1009_p0 = pnand %p1008_p13, %p1007_p12  ;;  %p1015_p5 = scmp.lt.u32.totalorder %s1006_s20, %s1223_s15 }
  0x17   : > { %p1014_p4 = por %p1013_p3, %p1012_p2 }
  0x18   : > { %p1010_p1 = pneg %p1009_p0 }
  0x19   : > { %p1016_p6 = por %p1015_p5, %p1014_p4 }
  0x1b   : > { %p1017_p8 = pnand %p1016_p6, %p1010_p1 }
  0x1d   : > { %1020 = shalt.err (!%p1017_p8)
}
  0x1e   : > { %s1021_s13 = scalar_lea.vmem %s1233_s17, 128  ;;  %s1122_s14 = smov [#allocation2]  }
  0x1f   : > { %p1022_p12 = scmp.ne.s32.totalorder %s1233_s17, %s1021_s13  ;;  %s1026_s16 = sshll.u32 %s1122_s14, 4  ;;  %s1027_s16 = int_to_ptr.vmem [resolvable:$false] %s1026_s16 }
  0x20   : > { %s1028_s21 = scalar_lea.vmem %s1027_s16, 256  ;;  %p1029_p11 = scmp.lt.s32.totalorder %s1233_s17, %s1027_s16 }
  0x21   : > { %p1024_p0 = pnand %p1022_p12, %p1008_p13  ;;  %p1030_p2 = scmp.lt.s32.totalorder %s1028_s21, %s1021_s13 }
  0x23   : > { %p1025_p10 = pneg %p1024_p0  ;;  %p1031_p3 = por %p1030_p2, %p1029_p11 }
  0x25   : > { %p1032_p4 = pnand %p1031_p3, %p1025_p10 }
  0x27   : > { %1035 = shalt.err (!%p1032_p4)
}
  0x28   : > { %941 = dma.hbm_to_vmem [thread:$0]  (!%p1229_p9), %s1223_s15, 128, %s1233_s17, %s240_s19  }
  0x29   : > { %p1389_p1 = scmp.lt.s32.totalorder %s1120_s26, 4  ;;  %p1390_p5 = scmp.ge.s32.totalorder %s1120_s26, 1 }
  0x2a   : > { %s1276_s30 = scalar_lea.hbm %s1383_s5, %s819_s11  ;;  %s261_s7 = scalar_lea.vmem [#allocation4], %s818_s12 }
  0x2b   : > { %p1267_p6 = pnand %p1390_p5, %p1389_p1  ;;  %s269_s13 = sshll.u32 %s261_s7, 4  ;;  %s270_s13 = int_to_ptr.vmem [resolvable:$true] %s269_s13 }
  0x2c   : > { %s258_s15 = scalar_lea.sflag [#allocation5], %s1214_s10  ;;  %s1036_s17 = scalar_lea.hbm %s1276_s30, 128 }
  0x2d   : > { %s1391_s20 = scalar_select %p1267_p6, 1, 0 }
  0x2e   : > { %p1037_p10 = scmp.ne.s32.totalorder %s1276_s30, %s1036_s17  ;;  %s1041_s11 = scalar_lea.hbm %s1383_s5, 384 }
  0x2f   : > { %p1042_p12 = scmp.lt.u32.totalorder %s1276_s30, %s1383_s5  ;;  %p1043_p0 = scmp.lt.u32.totalorder %s1041_s11, %s1036_s17 }
  0x30   : > { %p1039_p11 = pnand %p1037_p10, %p1008_p13  ;;  %p1045_p3 = scmp.lt.u32.totalorder %s1036_s17, %s1276_s30 }
  0x31   : > { %p1044_p2 = por %p1043_p0, %p1042_p12 }
  0x32   : > { %p1040_p8 = pneg %p1039_p11 }
  0x33   : > { %p1046_p4 = por %p1045_p3, %p1044_p2 }
  0x35   : > { %p1047_p1 = pnand %p1046_p4, %p1040_p8 }
  0x37   : > { %1050 = shalt.err (!%p1047_p1)
}
  0x38   : > { %s1051_s10 = scalar_lea.vmem %s270_s13, 128  ;;  %s1123_s12 = smov [#allocation4]  }
  0x39   : > { %p1052_p5 = scmp.ne.s32.totalorder %s270_s13, %s1051_s10  ;;  %s1056_s27 = sshll.u32 %s1123_s12, 4  ;;  %s1057_s27 = int_to_ptr.vmem [resolvable:$false] %s1056_s27 }
  0x3a   : > { %s1058_s29 = scalar_lea.vmem %s1057_s27, 256  ;;  %p1059_p7 = scmp.lt.s32.totalorder %s270_s13, %s1057_s27 }
  0x3b   : > { %p1054_p10 = pnand %p1052_p5, %p1008_p13  ;;  %p1060_p6 = scmp.lt.s32.totalorder %s1058_s29, %s1051_s10 }
  0x3d   : > { %p1055_p11 = pneg %p1054_p10  ;;  %p1061_p0 = por %p1060_p6, %p1059_p7 }
  0x3f   : > { %p1062_p12 = pnand %p1061_p0, %p1055_p11 }
  0x41   : > { %1065 = shalt.err (!%p1062_p12)
}
  0x42   : > { %944 = dma.hbm_to_vmem [thread:$0]  (!%p1229_p9), %s1276_s30, 128, %s270_s13, %s258_s15  }
  0x43   : > { %p1392_p8 = scmp.ne.s32.totalorder %s1391_s20, 0 }
  0x44   : > { %s280_s7 = sand.u32 (!%p1392_p8), 1, %s1104_s22   ;;  %p1393_p13 = scmp.ne.s32.totalorder (!%p1392_p8), %s1387_s8, 0 }
  0x45   : > { %278 = sbr.rel (%p1392_p8) target bundleno = 539 (0x21b), region = 44  ;;  %s823_s17 = sshll.u32 (!%p1392_p8), %s280_s7, 3 }
  0x46   : > { %s281_s19 = scalar_lea.sflag (!%p1392_p8), [#allocation3], %s280_s7  ;;  %s1303_s14 = scalar_lea.vmem (!%p1392_p8), [#allocation2], %s823_s17 }
  0x4c   : > { %1091 = dma.done.wait (%p1393_p13), %s281_s19, 128  }
  0x4d   : > { %1093 = vsyncadd (%p1393_p13), %s281_s19, 4294967168  ;;  %s290_s11 = scalar_lea.sflag [#allocation5], %s280_s7  ;;  %s1309_s18 = scalar_lea.vmem [#allocation4], %s823_s17 }
  0x4e   : > { %1095 = dma.done.wait (%p1393_p13), %s290_s11, 128  }
  0x4f   : > { %1097 = vsyncadd (%p1393_p13), %s290_s11, 4294967168  ;;  %v997_v0 = vld [vmem:[%s1379_s1] sm:$0xff]   ;;  %vm368_vm0 = vcmask 130048   ;;  %v999_v2 = vld [vmem:[%s1378_s0 + $0x8] sm:$0xff]   ;;  %vm425_vm1 = vcmask 261120   ;;  %v1124_v9 = vmov 0.0|0.0  }
  0x50   : > { %v998_v1 = vld [vmem:[%s1378_s0] sm:$0xff]   ;;  %868 = vmatprep.subr.bf16.mxu0 %v997_v0  ;;  %v1001_v4 = vld [vmem:[%s1380_s2 + $0x8] sm:$0xff]   ;;  %v1004_v7 = vld [vmem:[%s1382_s4 + $0x10] sm:$0xff]   ;;  %916 = vmatprep.subr.bf16.mxu1 %v1124_v9  ;;  %vm1125_vm2 = vmmov 0   ;;  %v1126_v10 = vmov 0.0   ;;  %vm624_vm3 = vcmask 523264  }
  0x51   : > { %869 = vmatpush3.bf16.msra.mxu0 %v997_v0  ;;  %870 = vmatprep.mubr.msk.bf16.mxu0 %vm368_vm0, %v998_v1  ;;  %v1000_v3 = vld [vmem:[%s1380_s2] sm:$0xff]   ;;  %v1003_v6 = vld [vmem:[%s1382_s4 + $0x8] sm:$0xff]   ;;  %v1005_v8 = vld [vmem:[%s1382_s4 + $0x18] sm:$0xff]   ;;  %p337_p7 = scmp.lt.s32.totalorder %s1112_s24, 2 }
  0x52   : > { %885 = vmatprep.subr.bf16.mxu0 %v1000_v3  ;;  %v1002_v5 = vld [vmem:[%s1382_s4] sm:$0xff]   ;;  %882 = vmatprep.mubr.msk.f32.mxu1 %vm1125_vm2, %v1126_v10  ;;  %v623_v30 = vld [vmem:[%s1309_s18] sm:$0xff] }
  0x53   : > { %v424_v20 = vld [vmem:[%s1303_s14] sm:$0xff]  ;;  %s1402_s24 = smov (!%p337_p7, %s1112_s24), 2 }
  0x54   : > { %871 = vmatmul.mubr.msk.bf16.vlgmr.msra.gmra.mrb[0].mxu0 %vm368_vm0, %v999_v2  ;;  %s825_s14 = sshll.u32 %s1402_s24, 3 }
  0x55   : > { %886 = vmatpush3.bf16.msra.mxu0 %v1000_v3  ;;  %889 = vmatprep.mubr.msk.bf16.mxu0 %vm425_vm1, %v1002_v5  ;;  %s340_s21 = scalar_lea.vmem %s1384_s6, %s825_s14 }
  0x56   : > { %887 = vmatprep.subr.bf16.mxu0 %v1001_v4 }
  0x59   : > { %888 = vmatpush3.bf16.msra.mxu0 %v1001_v4 }
  0x5c   : > { %890 = vmatmul.mubr.msk.bf16.vlgmr.msra.gmra.mrb[4].mxu0 %vm425_vm1, %v1003_v6 }
  0x5d   : > { %893 = vmatprep.mubr.msk.bf16.mxu0 %vm425_vm1, %v1004_v7 }
  0x64   : > { %894 = vmatmul.mubr.msk.bf16.gmra.mrb[8].mxu0 %vm425_vm1, %v1005_v8 }
 0x127   : > { %v872_v11 = vpop.f32.mrb[0].mxu0 }
 0x128   : > { %v409_v12 = vpop.f32.mrb[1].mxu0 }
 0x129   : > { %v873_v13 = vpop.f32.mrb[2].mxu0 }
 0x12a   : > { %v920_v14 = vpack.c.bf16 %v873_v13, %v872_v11  ;;  %v412_v15 = vpop.f32.mrb[3].mxu0 }
 0x12b   : > { %v917_v16 = vpack.c.bf16 %v412_v15, %v409_v12 }
 0x12d   : > { %918 = vmatpush3.bf16.msra.mxu1 %v917_v16 }
 0x12e   : > { %919 = vmatprep.subr.bf16.mxu1 %v1124_v9 }
 0x12f   : > { %v891_v17 = vpop.f32.mrb[4].mxu0 }
 0x130   : > { %v591_v18 = vpop.f32.mrb[5].mxu0 }
 0x131   : > { %921 = vmatpush3.bf16.msra.mxu1 %v920_v14  ;;  %v892_v19 = vpop.f32.mrb[6].mxu0 }
 0x132   : > { %v926_v21 = vpack.c.bf16 %v892_v19, %v891_v17  ;;  %v594_v22 = vpop.f32.mrb[7].mxu0  ;;  %922 = vmatprep.subr.bf16.mxu1 %v1124_v9 }
 0x133   : > { %v923_v23 = vpack.c.bf16 %v594_v22, %v591_v18 }
 0x134   : > { %883 = vmatmul.mubr.msk.f32.vlgmr.msra.gmra.mrb[0].mxu1 %vm425_vm1, %v424_v20 }
 0x135   : > { %924 = vmatpush3.bf16.msra.mxu1 %v923_v23  ;;  %913 = vmatprep.mubr.msk.f32.mxu1 %vm1125_vm2, %v1126_v10 }
 0x136   : > { %925 = vmatprep.subr.bf16.mxu1 %v1124_v9 }
 0x137   : > { %v895_v24 = vpop.f32.mrb[8].mxu0 }
 0x138   : > { %v607_v25 = vpop.f32.mrb[9].mxu0 }
 0x139   : > { %v896_v26 = vpop.f32.mrb[10].mxu0  ;;  %927 = vmatpush3.bf16.msra.mxu1 %v926_v21 }
 0x13a   : > { %v932_v27 = vpack.c.bf16 %v896_v26, %v895_v24  ;;  %v610_v28 = vpop.f32.mrb[11].mxu0  ;;  %928 = vmatprep.subr.bf16.mxu1 %v1124_v9 }
 0x13b   : > { %v929_v29 = vpack.c.bf16 %v610_v28, %v607_v25 }
 0x13d   : > { %930 = vmatpush3.bf16.msra.mxu1 %v929_v29 }
 0x13e   : > { %931 = vmatprep.subr.bf16.mxu1 %v1124_v9 }
 0x141   : > { %933 = vmatpush3.bf16.msra.mxu1 %v932_v27 }
 0x144   : > { %914 = vmatmul.mubr.msk.f32.vlgmr.msra.gmra.mrb[2].mxu1 %vm624_vm3, %v623_v30 }
 0x207   : > { %v495_v31 = vpop.f32.mrb[0].mxu1 }
 0x208   : > { %499 = vst.msk [vmem:[%s340_s21] sm:$0xff] %vm368_vm0, %v495_v31  ;;  %v884_v32 = vpop.f32.mrb[1].mxu1 }
 0x20f   : > { %v622_v33 = vld [vmem:[%s340_s21] sm:$0xff] }
 0x217   : > { %v694_v34 = vpop.f32.mrb[2].mxu1 }
 0x218   : > { %v698_v35 = vadd.f32 %v694_v34, %v622_v33  ;;  %v915_v36 = vpop.f32.mrb[3].mxu1 }
 0x21a   : > { %700 = vst.msk [vmem:[%s340_s21] sm:$0xff] %vm368_vm0, %v698_v35 }
 0x21b PF: > { %s22_s26 = sadd.s32 1, %s1120_s26   ;;  %s1394_s21 = smov %s1104_s22 }
 0x21c   : > { %p19_p9 = scmp.ge.s32.totalorder %s22_s26, 5   ;;  %s1395_s22 = smov %s1108_s23 }
 0x21d   : > { %s1396_s23 = smov %s1211_s9  ;;  %s1397_s24 = smov %s1116_s25 }
 0x21e   : > { %s1398_s25 = smov %s1400_s28  ;;  %21 = sbr.rel (!%p19_p9) target bundleno = 6 (0x6), region = 104 }
 0x225   :  { %720 = vsyncpa [#allocation3], 1 }
 0x226   :  { %722 = vsyncpa [#allocation3 + $0x1], 1 }
 0x227   :  { %723 = vsyncpa [#allocation5], 1 }
 0x228   :  { %725 = vsyncpa [#allocation5 + $0x1], 1 }

</bundles_post_ra>
